<compile_context>
chip_gen: v6e
topology: v6e:2x2x1
jax: 0.10.0
libtpu: 0.0.40
codegen_flags: <defaults>
</compile_context>

<pallas_src>
import jax
import jax.numpy as jnp
from jax.experimental import pallas as pl
from jax.experimental.pallas import tpu as pltpu

LN_EPS = 1e-5  # torch.nn.LayerNorm default


def _round_up(x, m):
    return ((x + m - 1) // m) * m


def _make_kernel(h, fp):
    inv_h = 1.0 / float(h)

    def _layernorm(z, gamma, beta):
        # Feature dim is the sublane axis. Single-pass stats: the two sublane
        # reductions are independent (no mu -> var serial dependency).
        s = jnp.sum(z, axis=0, keepdims=True)          # (1, TILE_B)
        s2 = jnp.sum(z * z, axis=0, keepdims=True)     # (1, TILE_B)
        mu = s * inv_h
        var = s2 * inv_h - mu * mu
        return (z - mu) * jax.lax.rsqrt(var + LN_EPS) * gamma + beta

    def kernel(x_ref, w_ref, v_ref, o_ref):
        x = x_ref[...]                      # (fp, TILE_B), batch in lanes
        w1t = w_ref[0:h, 0:fp]              # (h, fp)   == w1^T (zero-padded cols)
        w2t = w_ref[h:2 * h, 0:h]           # (h, h)    == w2^T
        b1, g1, be1 = v_ref[:, 0:1], v_ref[:, 1:2], v_ref[:, 2:3]   # (h, 1)
        b2, g2, be2 = v_ref[:, 3:4], v_ref[:, 4:5], v_ref[:, 5:6]   # (h, 1)
        w3 = v_ref[:, 6:7]                  # (h, 1)    == w3[:, 0]
        b3 = v_ref[0:1, 7:8]                # (1, 1)    == b3 scalar

        # Linear(in -> h) + LayerNorm + ReLU   (MXU: M=h, K=fp, N=TILE_B)
        z = jnp.dot(w1t, x, preferred_element_type=jnp.float32) + b1
        z = jnp.maximum(_layernorm(z, g1, be1), 0.0)

        # Linear(h -> h) + LayerNorm + ReLU    (MXU: M=h, K=h, N=TILE_B)
        z = jnp.dot(w2t, z, preferred_element_type=jnp.float32) + b2
        z = jnp.maximum(_layernorm(z, g2, be2), 0.0)

        # Linear(h -> 1): sublane reduce -> lane-dense (1, TILE_B) row.
        o_ref[...] = jnp.sum(z * w3, axis=0, keepdims=True) + b3

    return kernel


def pack_params(params, in_features, h):
    """Consolidate the 10 small parameter tensors into 2 VMEM-resident slabs
    laid out for the feature-major (batch-in-lanes) kernel."""
    fp = _round_up(in_features, 8)          # padded feature rows of x^T
    w = max(h, fp)                          # slab lane width
    w1t = jnp.zeros((h, w), jnp.float32).at[:, :in_features].set(
        params["w1"].astype(jnp.float32).T)
    w2t = jnp.zeros((h, w), jnp.float32).at[:, :h].set(
        params["w2"].astype(jnp.float32).T)
    wslab = jnp.concatenate([w1t, w2t], axis=0)                     # (2h, w)

    b3_col = jnp.full((h,), params["b3"].reshape(()), jnp.float32)
    vecs = jnp.stack(
        [
            params["b1"].reshape(h), params["g1"].reshape(h), params["be1"].reshape(h),
            params["b2"].reshape(h), params["g2"].reshape(h), params["be2"].reshape(h),
            params["w3"].reshape(h), b3_col,
        ],
        axis=1,
    ).astype(jnp.float32)                                            # (h, 8)
    return wslab, vecs


def _choose_tile_b(batch):
    """Lane-aligned batch tile; >=2 grid steps when the batch is big enough so a
    v7x can shard the parallel axis over its 2 TensorCores."""
    lane = 128
    target = 4096
    b128 = _round_up(max(batch, 1), lane)
    if b128 <= 2 * lane:
        return b128                       # tiny batch: single small tile
    if b128 <= 2 * target:
        return _round_up(pl.cdiv(b128, 2), lane)   # exactly ~2 tiles
    return target                          # large batch: big tiles, many steps


def mlp_forward(x, wslab, vecs, *, h):
    """x: (B, in_features) float32 -> (B,) predictions (== y.flatten())."""
    B, F = x.shape
    fp = _round_up(F, 8)
    assert wslab.shape[0] == 2 * h and fp <= wslab.shape[1], (wslab.shape, h, fp)

    tile_b = _choose_tile_b(B)
    bp = _round_up(B, tile_b)
    grid = bp // tile_b

    # Feature-major input: (fp, Bp). Single wrapper-side transpose+pad of the
    # tiny (B, 7) input; everything downstream is lane-dense.
    xt = jnp.zeros((fp, bp), jnp.float32).at[:F, :B].set(
        x.astype(jnp.float32).T)

    flops = 2 * bp * (fp * h + h * h + h) + 14 * bp * h   # matmuls + LN/ReLU work
    cost = pl.CostEstimate(
        flops=int(flops),
        transcendentals=int(2 * bp),                       # two rsqrt per column
        bytes_accessed=int(4 * (xt.size + bp + wslab.size + vecs.size)),
    )

    out = pl.pallas_call(
        _make_kernel(h, fp),
        out_shape=jax.ShapeDtypeStruct((1, bp), jnp.float32),
        grid=(grid,),
        in_specs=[
            pl.BlockSpec((fp, tile_b), lambda i: (0, i)),               # activations
            pl.BlockSpec(wslab.shape, lambda i: (0, 0)),                # weight slab (resident)
            pl.BlockSpec(vecs.shape, lambda i: (0, 0)),                 # vector slab (resident)
        ],
        out_specs=pl.BlockSpec((1, tile_b), lambda i: (0, i)),          # lane-dense row
        compiler_params=pltpu.CompilerParams(
            dimension_semantics=("parallel",),                          # v7x: 2 TCs
        ),
        cost_estimate=cost,
    )(xt, wslab, vecs)
    return out[0, :B]


def init_params(key, input_dim, hidden_dim):
    """Deterministic init mimicking torch defaults (Linear: U(-1/sqrt(fan_in), ..),
    LayerNorm: weight=1, bias=0)."""
    in_features = input_dim + 1
    h = hidden_dim // 2
    ks = jax.random.split(key, 6)

    def lin(kw, kb, fan_in, fan_out):
        bound = 1.0 / jnp.sqrt(jnp.float32(fan_in))
        w = jax.random.uniform(kw, (fan_in, fan_out), jnp.float32, -bound, bound)
        b = jax.random.uniform(kb, (1, fan_out), jnp.float32, -bound, bound)
        return w, b

    w1, b1 = lin(ks[0], ks[1], in_features, h)
    w2, b2 = lin(ks[2], ks[3], h, h)
    w3, b3 = lin(ks[4], ks[5], h, 1)

    return {
        "w1": w1, "b1": b1,
        "g1": jnp.ones((1, h), jnp.float32), "be1": jnp.zeros((1, h), jnp.float32),
        "w2": w2, "b2": b2,
        "g2": jnp.ones((1, h), jnp.float32), "be2": jnp.zeros((1, h), jnp.float32),
        "w3": w3, "b3": b3,
    }


if __name__ == "__main__":
    INPUT_DIM = 6       # Model.input_dim
    HIDDEN_DIM = 32     # args.dimension
    BATCH = 8
    H = HIDDEN_DIM // 2

    key = jax.random.PRNGKey(0)
    k_params, k_x = jax.random.split(key)

    params = init_params(k_params, INPUT_DIM, HIDDEN_DIM)
    x = jax.random.normal(k_x, (BATCH, INPUT_DIM + 1), jnp.float32)

    wslab, vecs = pack_params(params, INPUT_DIM + 1, H)
    y = mlp_forward(x, wslab, vecs, h=H)
    jax.block_until_ready(y)

    assert y.shape == (BATCH,), y.shape

    # Pure-JAX reference check (torch-style two-pass LayerNorm).
    def ref(x, p):
        def ln(z, g, b):
            mu = z.mean(-1, keepdims=True)
            var = ((z - mu) ** 2).mean(-1, keepdims=True)
            return (z - mu) / jnp.sqrt(var + LN_EPS) * g + b
        z = jnp.maximum(ln(x @ p["w1"] + p["b1"], p["g1"], p["be1"]), 0.0)
        z = jnp.maximum(ln(z @ p["w2"] + p["b2"], p["g2"], p["be2"]), 0.0)
        return (z @ p["w3"] + p["b3"]).reshape(-1)

    y_ref = ref(x, params)
    assert jnp.allclose(y, y_ref, atol=1e-4, rtol=1e-4), (y, y_ref)

    print("KERNEL_OK")
</pallas_src>

<mosaic_0001>
module attributes {stable_mosaic.version = 11 : i64} {
  func.func @kernel(%arg0: i32, %arg1: memref<8x128xf32, #tpu.memory_space<vmem>>, %arg2: memref<32x16xf32, #tpu.memory_space<vmem>>, %arg3: memref<16x8xf32, #tpu.memory_space<vmem>>, %arg4: memref<1x128xf32, #tpu.memory_space<vmem>>) attributes {dimension_semantics = [#tpu.dimension_semantics<parallel>], iteration_bounds = array<i64: 1>, scalar_prefetch = 0 : i64, scratch_operands = 0 : i64, tpu.core_type = #tpu.core_type<tc>, window_params = [{transform_indices = @transform_0, window_bounds = array<i64: 8, 128>}, {pipeline_mode = #tpu.pipeline_mode<synchronous>, transform_indices = @transform_1, window_bounds = array<i64: 32, 16>}, {pipeline_mode = #tpu.pipeline_mode<synchronous>, transform_indices = @transform_2, window_bounds = array<i64: 16, 8>}, {transform_indices = @transform_3, window_bounds = array<i64: 1, 128>}]} {
    %c0 = arith.constant 0 : index
    %c0_0 = arith.constant 0 : index
    %0 = vector.load %arg1[%c0, %c0_0] : memref<8x128xf32, #tpu.memory_space<vmem>>, vector<8x128xf32>
    %c0_1 = arith.constant 0 : index
    %c0_2 = arith.constant 0 : index
    %1 = vector.load %arg2[%c0_1, %c0_2] : memref<32x16xf32, #tpu.memory_space<vmem>>, vector<16x8xf32>
    %c16 = arith.constant 16 : index
    %c0_3 = arith.constant 0 : index
    %2 = vector.load %arg2[%c16, %c0_3] : memref<32x16xf32, #tpu.memory_space<vmem>>, vector<16x16xf32>
    %c0_4 = arith.constant 0 : index
    %c0_5 = arith.constant 0 : index
    %3 = vector.load %arg3[%c0_4, %c0_5] : memref<16x8xf32, #tpu.memory_space<vmem>>, vector<16x1xf32>
    %c0_6 = arith.constant 0 : index
    %c1 = arith.constant 1 : index
    %4 = vector.load %arg3[%c0_6, %c1] : memref<16x8xf32, #tpu.memory_space<vmem>>, vector<16x1xf32>
    %c0_7 = arith.constant 0 : index
    %c2 = arith.constant 2 : index
    %5 = vector.load %arg3[%c0_7, %c2] : memref<16x8xf32, #tpu.memory_space<vmem>>, vector<16x1xf32>
    %c0_8 = arith.constant 0 : index
    %c3 = arith.constant 3 : index
    %6 = vector.load %arg3[%c0_8, %c3] : memref<16x8xf32, #tpu.memory_space<vmem>>, vector<16x1xf32>
    %c0_9 = arith.constant 0 : index
    %c4 = arith.constant 4 : index
    %7 = vector.load %arg3[%c0_9, %c4] : memref<16x8xf32, #tpu.memory_space<vmem>>, vector<16x1xf32>
    %c0_10 = arith.constant 0 : index
    %c5 = arith.constant 5 : index
    %8 = vector.load %arg3[%c0_10, %c5] : memref<16x8xf32, #tpu.memory_space<vmem>>, vector<16x1xf32>
    %c0_11 = arith.constant 0 : index
    %c6 = arith.constant 6 : index
    %9 = vector.load %arg3[%c0_11, %c6] : memref<16x8xf32, #tpu.memory_space<vmem>>, vector<16x1xf32>
    %c0_12 = arith.constant 0 : index
    %c7 = arith.constant 7 : index
    %10 = vector.load %arg3[%c0_12, %c7] : memref<16x8xf32, #tpu.memory_space<vmem>>, vector<1x1xf32>
    %cst = arith.constant dense<0.000000e+00> : vector<16x128xf32>
    %11 = tpu.matmul %1, %0, %cst {dimension_numbers = #tpu.dot_dimension_numbers<[1], [0], [0], [1], [0, 0, 1, 1], [], []>} : vector<16x8xf32>, vector<8x128xf32>, vector<16x128xf32> -> vector<16x128xf32>
    %12 = vector.broadcast %3 : vector<16x1xf32> to vector<16x128xf32>
    %13 = arith.addf %11, %12 : vector<16x128xf32>
    %cst_13 = arith.constant dense<0.000000e+00> : vector<128xf32>
    %14 = vector.multi_reduction <add>, %13, %cst_13 [0] : vector<16x128xf32> to vector<128xf32>
    %15 = vector.shape_cast %14 : vector<128xf32> to vector<1x128xf32>
    %16 = arith.mulf %13, %13 : vector<16x128xf32>
    %cst_14 = arith.constant dense<0.000000e+00> : vector<128xf32>
    %17 = vector.multi_reduction <add>, %16, %cst_14 [0] : vector<16x128xf32> to vector<128xf32>
    %18 = vector.shape_cast %17 : vector<128xf32> to vector<1x128xf32>
    %cst_15 = arith.constant 6.250000e-02 : f32
    %19 = vector.broadcast %cst_15 : f32 to vector<1x128xf32>
    %20 = arith.mulf %15, %19 : vector<1x128xf32>
    %cst_16 = arith.constant 6.250000e-02 : f32
    %21 = vector.broadcast %cst_16 : f32 to vector<1x128xf32>
    %22 = arith.mulf %18, %21 : vector<1x128xf32>
    %23 = arith.mulf %20, %20 : vector<1x128xf32>
    %24 = arith.subf %22, %23 : vector<1x128xf32>
    %25 = vector.broadcast %20 : vector<1x128xf32> to vector<16x128xf32>
    %26 = arith.subf %13, %25 : vector<16x128xf32>
    %cst_17 = arith.constant 9.99999974E-6 : f32
    %27 = vector.broadcast %cst_17 : f32 to vector<1x128xf32>
    %28 = arith.addf %24, %27 : vector<1x128xf32>
    %29 = math.rsqrt %28 : vector<1x128xf32>
    %30 = vector.broadcast %29 : vector<1x128xf32> to vector<16x128xf32>
    %31 = arith.mulf %26, %30 : vector<16x128xf32>
    %32 = vector.broadcast %4 : vector<16x1xf32> to vector<16x128xf32>
    %33 = arith.mulf %31, %32 : vector<16x128xf32>
    %34 = vector.broadcast %5 : vector<16x1xf32> to vector<16x128xf32>
    %35 = arith.addf %33, %34 : vector<16x128xf32>
    %cst_18 = arith.constant 0.000000e+00 : f32
    %36 = vector.broadcast %cst_18 : f32 to vector<16x128xf32>
    %37 = arith.maximumf %35, %36 : vector<16x128xf32>
    %cst_19 = arith.constant dense<0.000000e+00> : vector<16x128xf32>
    %38 = tpu.matmul %2, %37, %cst_19 {dimension_numbers = #tpu.dot_dimension_numbers<[1], [0], [0], [1], [0, 0, 1, 1], [], []>} : vector<16x16xf32>, vector<16x128xf32>, vector<16x128xf32> -> vector<16x128xf32>
    %39 = vector.broadcast %6 : vector<16x1xf32> to vector<16x128xf32>
    %40 = arith.addf %38, %39 : vector<16x128xf32>
    %cst_20 = arith.constant dense<0.000000e+00> : vector<128xf32>
    %41 = vector.multi_reduction <add>, %40, %cst_20 [0] : vector<16x128xf32> to vector<128xf32>
    %42 = vector.shape_cast %41 : vector<128xf32> to vector<1x128xf32>
    %43 = arith.mulf %40, %40 : vector<16x128xf32>
    %cst_21 = arith.constant dense<0.000000e+00> : vector<128xf32>
    %44 = vector.multi_reduction <add>, %43, %cst_21 [0] : vector<16x128xf32> to vector<128xf32>
    %45 = vector.shape_cast %44 : vector<128xf32> to vector<1x128xf32>
    %cst_22 = arith.constant 6.250000e-02 : f32
    %46 = vector.broadcast %cst_22 : f32 to vector<1x128xf32>
    %47 = arith.mulf %42, %46 : vector<1x128xf32>
    %cst_23 = arith.constant 6.250000e-02 : f32
    %48 = vector.broadcast %cst_23 : f32 to vector<1x128xf32>
    %49 = arith.mulf %45, %48 : vector<1x128xf32>
    %50 = arith.mulf %47, %47 : vector<1x128xf32>
    %51 = arith.subf %49, %50 : vector<1x128xf32>
    %52 = vector.broadcast %47 : vector<1x128xf32> to vector<16x128xf32>
    %53 = arith.subf %40, %52 : vector<16x128xf32>
    %cst_24 = arith.constant 9.99999974E-6 : f32
    %54 = vector.broadcast %cst_24 : f32 to vector<1x128xf32>
    %55 = arith.addf %51, %54 : vector<1x128xf32>
    %56 = math.rsqrt %55 : vector<1x128xf32>
    %57 = vector.broadcast %56 : vector<1x128xf32> to vector<16x128xf32>
    %58 = arith.mulf %53, %57 : vector<16x128xf32>
    %59 = vector.broadcast %7 : vector<16x1xf32> to vector<16x128xf32>
    %60 = arith.mulf %58, %59 : vector<16x128xf32>
    %61 = vector.broadcast %8 : vector<16x1xf32> to vector<16x128xf32>
    %62 = arith.addf %60, %61 : vector<16x128xf32>
    %cst_25 = arith.constant 0.000000e+00 : f32
    %63 = vector.broadcast %cst_25 : f32 to vector<16x128xf32>
    %64 = arith.maximumf %62, %63 : vector<16x128xf32>
    %65 = vector.broadcast %9 : vector<16x1xf32> to vector<16x128xf32>
    %66 = arith.mulf %64, %65 : vector<16x128xf32>
    %cst_26 = arith.constant dense<0.000000e+00> : vector<128xf32>
    %67 = vector.multi_reduction <add>, %66, %cst_26 [0] : vector<16x128xf32> to vector<128xf32>
    %68 = vector.shape_cast %67 : vector<128xf32> to vector<1x128xf32>
    %69 = vector.broadcast %10 : vector<1x1xf32> to vector<1x128xf32>
    %70 = arith.addf %68, %69 : vector<1x128xf32>
    %c0_27 = arith.constant 0 : index
    %c0_28 = arith.constant 0 : index
    %71 = vector.load %arg4[%c0_27, %c0_28] : memref<1x128xf32, #tpu.memory_space<vmem>>, vector<1x128xf32>
    tpu.vector_store %arg4[%c0_27, %c0_28], %70 {strides = array<i32>} : memref<1x128xf32, #tpu.memory_space<vmem>>, vector<1x128xf32>,
    return
  }
  func.func @transform_0(%arg0: i32) -> (i32, i32) {
    %c0_i32 = arith.constant 0 : i32
    %c0_i32_0 = arith.constant 0 : i32
    return %c0_i32, %arg0 : i32, i32
  }
  func.func @transform_1(%arg0: i32) -> (i32, i32) {
    %c0_i32 = arith.constant 0 : i32
    %c0_i32_0 = arith.constant 0 : i32
    %c0_i32_1 = arith.constant 0 : i32
    return %c0_i32, %c0_i32_0 : i32, i32
  }
  func.func @transform_2(%arg0: i32) -> (i32, i32) {
    %c0_i32 = arith.constant 0 : i32
    %c0_i32_0 = arith.constant 0 : i32
    %c0_i32_1 = arith.constant 0 : i32
    return %c0_i32, %c0_i32_0 : i32, i32
  }
  func.func @transform_3(%arg0: i32) -> (i32, i32) {
    %c0_i32 = arith.constant 0 : i32
    %c0_i32_0 = arith.constant 0 : i32
    return %c0_i32, %arg0 : i32, i32
  }
}

</mosaic_0001>

<bundles_post_ra>
// kernel: tpu_custom_call.1
= control target key start
LH: loop header
LB: loop body
LE: loop exit
PB: predicated region body
PF: predicated region fallthrough
CT: control target
= control target key end

     0   :  { %vm33_vm0 = vcmask 64512   ;;  %s468_s0 = inlined_call_operand.vmem [shape: f32[8,128], index: 0, kind: input, shape index: {}]   ;;  %s469_s1 = inlined_call_operand.vmem [shape: f32[32,16], index: 1, kind: input, shape index: {}]   ;;  %s470_s2 = inlined_call_operand.vmem [shape: f32[16,8], index: 2, kind: input, shape index: {}]   ;;  %s471_s3 = inlined_call_operand.hbm [shape: f32[1,128], index: 3, kind: output, shape index: {}]  }
   0x1   :  { %v15_v0 = vld [vmem:[%s468_s0] sm:$0xff]  ;;  %v17_v2 = vld [vmem:[%s469_s1 + $0x8] sm:$0xff] }
   0x2   :  { %v16_v1 = vld [vmem:[%s469_s1] sm:$0xff]  ;;  %350 = vmatprep.subr.mxu0 %v15_v0 }
   0x3   :  { %352 = vmatprep.mubr.msk.f32.mxu0 %vm33_vm0, %v16_v1  ;;  %v20_v3 = vld [vmem:[%s470_s2] sm:$0xff] }
   0x4   :  { %8 = vsyncpa [#allocation3], 0  ;;  %351 = vmatpush3.msra.mxu0 %v15_v0  ;;  %v410_v4 = vmov 0   ;;  %v21_v5 = vld [vmem:[%s470_s2 + $0x8] sm:$0xff]  ;;  %v411_v6 = vmov 1   ;;  %v412_v7 = vmov 2  }
   0x5   :  { %371 = vset.pattern.permute.xlu0 %v410_v4  ;;  %353 = vmatmul.mubr.msk.f32.vlgmr.msra.gmra.mxu0 %vm33_vm0, %v17_v2  ;;  %v18_v8 = vld [vmem:[%s469_s1 + $0x10] sm:$0xff]  ;;  %vm171_vm1 = vcmask 130048   ;;  %v413_v9 = vmov 3   ;;  %v414_v10 = vmov 4   ;;  %v415_v11 = vmov 5   ;;  %v19_v57 = vld [vmem:[%s469_s1 + $0x18] sm:$0xff] }
   0x6   :  { %25 = vperm.xlu0 %371, %v20_v3   ;;  %372 = vset.pattern.permute.xlu1 %v411_v6  ;;  %v416_v12 = vmov 6   ;;  %v417_v13 = vmov 7   ;;  %v22_v14 = vld [vmem:[%s470_s2] sm:$0x1]  ;;  %s418_s1 = smov [#allocation2]  }
   0x7   :  { %146 = vperm.xlu1 %372, %v21_v5   ;;  %359 = vmatprep.mubr.msk.f32.mxu1 %vm171_vm1, %v18_v8  ;;  %s331_s26 = sshll.u32 %s418_s1, 4  ;;  %s332_s26 = int_to_ptr.vmem [resolvable:$true] %s331_s26 }
   0x8   :  { %s388_s27 = scalar_lea.vmem %s332_s26, 16  ;;  %s392_s28 = scalar_lea.vmem %s332_s26, 32 }
   0x9   :  { %p389_p0 = scmp.ne.s32.totalorder %s332_s26, %s388_s27  ;;  %p393_p1 = scmp.lt.s32.totalorder %s332_s26, %s332_s26 }
   0xa   :  { %30 = vperm.xlu0 %371, %v21_v5   ;;  %p394_p2 = scmp.lt.s32.totalorder %s392_s28, %s388_s27 }
   0xb   :  { %142 = vperm.xlu1 %372, %v20_v3  }
   0xc   :  { %p395_p3 = por %p394_p2, %p393_p1 }
   0xe   :  { %373 = vset.pattern.permute.xlu0 %v412_v7  ;;  %p396_p4 = pnand %p395_p3, %p389_p0 }
   0xf   :  { %156 = vperm.xlu0 %373, %v21_v5   ;;  %374 = vset.pattern.permute.xlu1 %v412_v7 }
  0x10   :  { %152 = vperm.xlu1 %374, %v20_v3  }
  0x13   :  { %376 = vset.pattern.permute.xlu0 %v413_v9 }
  0x14   :  { %375 = vset.pattern.permute.xlu1 %v413_v9  ;;  %168 = vperm.xlu0 %376, %v21_v5  }
  0x15   :  { %164 = vperm.xlu1 %375, %v20_v3  }
  0x18   :  { %378 = vset.pattern.permute.xlu0 %v415_v11 }
  0x19   :  { %377 = vset.pattern.permute.xlu1 %v414_v10  ;;  %290 = vperm.xlu0 %378, %v20_v3  }
  0x1a   :  { %280 = vperm.xlu1 %377, %v20_v3  }
  0x1d   :  { %381 = vset.pattern.permute.xlu0 %v416_v12 }
  0x1e   :  { %284 = vperm.xlu1 %377, %v21_v5   ;;  %306 = vperm.xlu0 %381, %v21_v5  }
  0x22   :  { %379 = vset.pattern.permute.xlu1 %v415_v11  ;;  %383 = vset.pattern.permute.xlu0 %v417_v13 }
  0x23   :  { %294 = vperm.xlu1 %379, %v21_v5  }
  0x27   :  { %380 = vset.pattern.permute.xlu1 %v416_v12 }
  0x28   :  { %302 = vperm.xlu1 %380, %v20_v3  }
  0x2c   :  { %382 = vset.pattern.permute.xlu1 %v417_v13 }
  0x2d   :  { %320 = vperm.xlu1 %382, %v22_v14  }
  0x81   :  { %v26_v15 = vpop.permute.xlu0 %25 }
  0x82   :  { %v147_v42 = vpop.permute.xlu1 %146 }
  0x85   :  { %v31_v16 = vpop.permute.xlu0 %30 }
  0x86   :  { %v143_v43 = vpop.permute.xlu1 %142 }
  0x8a   :  { %v157_v50 = vpop.permute.xlu0 %156 }
  0x8b   :  { %v153_v49 = vpop.permute.xlu1 %152 }
  0x8f   :  { %v169_v58 = vpop.permute.xlu0 %168 }
  0x90   :  { %v165_v60 = vpop.permute.xlu1 %164 }
  0xc5   :  { %v354_v17 = vpop.f32.mrf.mxu0 }
  0xc6   :  { %v112_v18 = vadd.f32 %v354_v17, %v31_v16 }
  0xc7   :  { %v106_v19 = vpop.f32.mrf.mxu0 }
  0xc8   :  { %v107_v20 = vadd.f32 %v106_v19, %v26_v15  ;;  %v123_v21 = vmul.f32 %v112_v18, %v112_v18 }
  0xca   :  { %v115_v22 = vadd.f32 %v112_v18, %v107_v20  ;;  %v122_v23 = vmul.f32 %v107_v20, %v107_v20 }
  0xcc   :  { %v116_v24 = vrot.slane %v115_v22, 4  ;;  %v124_v25 = vadd.f32 %v123_v21, %v122_v23  ;;  %v281_v21 = vpop.permute.xlu1 %280 }
  0xce   :  { %v117_v26 = vadd.f32 %v116_v24, %v115_v22  ;;  %v125_v27 = vrot.slane %v124_v25, 4 }
  0xd0   :  { %v118_v28 = vrot.slane %v117_v26, 2  ;;  %v126_v29 = vadd.f32 %v125_v27, %v124_v25  ;;  %v285_v22 = vpop.permute.xlu1 %284  ;;  %v291_v27 = vpop.permute.xlu0 %290 }
  0xd2   :  { %v119_v30 = vadd.f32 %v118_v28, %v117_v26  ;;  %v127_v31 = vrot.slane %v126_v29, 2 }
  0xd4   :  { %v120_v32 = vrot.slane %v119_v30, 1  ;;  %v128_v33 = vadd.f32 %v127_v31, %v126_v29  ;;  %v295_v26 = vpop.permute.xlu1 %294 }
  0xd6   :  { %v129_v34 = vrot.slane %v128_v33, 1  ;;  %v121_v35 = vadd.f32 %v120_v32, %v119_v30 }
  0xd8   :  { %v130_v36 = vadd.f32 %v129_v34, %v128_v33  ;;  %v131_v37 = vmul.f32 0.0625, %v121_v35  ;;  %v303_v34 = vpop.permute.xlu1 %302  ;;  %v307_v35 = vpop.permute.xlu0 %306 }
  0xda   :  { %v132_v38 = vmul.f32 0.0625, %v130_v36  ;;  %v133_v39 = vmul.f32 %v131_v37, %v131_v37  ;;  %v136_v44 = vsub.f32 %v112_v18, %v131_v37  ;;  %v135_v45 = vsub.f32 %v107_v20, %v131_v37 }
  0xdc   :  { %v134_v40 = vsub.f32 %v132_v38, %v133_v39 }
  0xde   :  { %v137_v41 = vadd.f32 1e-05, %v134_v40 }
  0xe0   :  { %384 = vrsqrt.f32 %v137_v41 }
  0xed   :  { %v385_v46 = vpop.eup %384 }
  0xee   :  { %v140_v47 = vmul.f32 %v385_v46, %v136_v44  ;;  %v139_v48 = vmul.f32 %v385_v46, %v135_v45  ;;  %v321_v46 = vpop.permute.xlu1 %320 }
  0xf0   :  { %v150_v51 = vmul.f32 %v147_v42, %v140_v47  ;;  %v149_v52 = vmul.f32 %v143_v43, %v139_v48 }
  0xf2   :  { %v159_v53 = vadd.f32 %v153_v49, %v149_v52  ;;  %v160_v54 = vadd.f32 %v157_v50, %v150_v51 }
  0xf4   :  { %v162_v55 = vmax.f32 %v160_v54, 0.0  ;;  %v161_v56 = vmax.f32 %v159_v53, 0.0 }
  0xf6   :  { %355 = vmatprep.subr.mxu1 %v162_v55 }
  0xf7   :  { %356 = vmatpush3.msra.mxu1 %v162_v55 }
  0xf8   :  { %357 = vmatprep.subr.mxu1 %v161_v56 }
  0xf9   :  { %358 = vmatpush3.msra.mxu1 %v161_v56 }
  0xfa   :  { %360 = vmatmul.mubr.msk.f32.vlgmr.msra.gmra.mxu1 %vm171_vm1, %v19_v57 }
 0x1ba   :  { %v361_v59 = vpop.f32.mrf.mxu1 }
 0x1bb   :  { %v250_v61 = vadd.f32 %v361_v59, %v169_v58 }
 0x1bc   :  { %v244_v62 = vpop.f32.mrf.mxu1 }
 0x1bd   :  { %v245_v63 = vadd.f32 %v244_v62, %v165_v60  ;;  %v261_v0 = vmul.f32 %v250_v61, %v250_v61 }
 0x1bf   :  { %v253_v1 = vadd.f32 %v250_v61, %v245_v63  ;;  %v260_v2 = vmul.f32 %v245_v63, %v245_v63 }
 0x1c1   :  { %v254_v3 = vrot.slane %v253_v1, 4  ;;  %v262_v4 = vadd.f32 %v261_v0, %v260_v2 }
 0x1c3   :  { %v255_v5 = vadd.f32 %v254_v3, %v253_v1  ;;  %v263_v6 = vrot.slane %v262_v4, 4 }
 0x1c5   :  { %v256_v7 = vrot.slane %v255_v5, 2  ;;  %v264_v8 = vadd.f32 %v263_v6, %v262_v4 }
 0x1c7   :  { %v257_v9 = vadd.f32 %v256_v7, %v255_v5  ;;  %v265_v10 = vrot.slane %v264_v8, 2 }
 0x1c9   :  { %v258_v11 = vrot.slane %v257_v9, 1  ;;  %v266_v12 = vadd.f32 %v265_v10, %v264_v8 }
 0x1cb   :  { %v267_v13 = vrot.slane %v266_v12, 1  ;;  %v259_v14 = vadd.f32 %v258_v11, %v257_v9 }
 0x1cd   :  { %v268_v15 = vadd.f32 %v267_v13, %v266_v12  ;;  %v269_v16 = vmul.f32 0.0625, %v259_v14 }
 0x1cf   :  { %v270_v17 = vmul.f32 0.0625, %v268_v15  ;;  %v271_v18 = vmul.f32 %v269_v16, %v269_v16  ;;  %v273_v23 = vsub.f32 %v245_v63, %v269_v16  ;;  %v274_v24 = vsub.f32 %v250_v61, %v269_v16 }
 0x1d1   :  { %v272_v19 = vsub.f32 %v270_v17, %v271_v18 }
 0x1d3   :  { %v275_v20 = vadd.f32 1e-05, %v272_v19 }
 0x1d5   :  { %386 = vrsqrt.f32 %v275_v20 }
 0x1e2   :  { %v387_v25 = vpop.eup %386 }
 0x1e3   :  { %v277_v28 = vmul.f32 %v387_v25, %v273_v23  ;;  %v278_v29 = vmul.f32 %v387_v25, %v274_v24 }
 0x1e5   :  { %v287_v30 = vmul.f32 %v281_v21, %v277_v28  ;;  %v288_v31 = vmul.f32 %v285_v22, %v278_v29 }
 0x1e7   :  { %v298_v32 = vadd.f32 %v295_v26, %v288_v31  ;;  %v297_v33 = vadd.f32 %v291_v27, %v287_v30 }
 0x1e9   :  { %v300_v36 = vmax.f32 %v298_v32, 0.0  ;;  %v299_v37 = vmax.f32 %v297_v33, 0.0 }
 0x1eb   :  { %v309_v38 = vmul.f32 %v303_v34, %v299_v37  ;;  %v310_v39 = vmul.f32 %v307_v35, %v300_v36 }
 0x1ed   :  { %v311_v40 = vadd.f32 %v310_v39, %v309_v38 }
 0x1ef   :  { %v312_v41 = vrot.slane %v311_v40, 4 }
 0x1f1   :  { %v313_v42 = vadd.f32 %v312_v41, %v311_v40 }
 0x1f3   :  { %v314_v43 = vrot.slane %v313_v42, 2 }
 0x1f5   :  { %v315_v44 = vadd.f32 %v314_v43, %v313_v42 }
 0x1f7   :  { %v316_v45 = vrot.slane %v315_v44, 1 }
 0x1f9   :  { %v317_v47 = vadd.f32 %v316_v45, %v315_v44 }
 0x1fb   :  { %v323_v48 = vadd.f32 %v321_v46, %v317_v47 }
 0x1fd   :  { %324 = vst [vmem:[#allocation2] sm:$0x1] %v323_v48 }
 0x1fe   :  { %399 = shalt.err (!%p396_p4)
}
 0x1ff   :  { %334 = dma.vmem_to_hbm [thread:$0]  %s332_s26, 16, %s471_s3, [#allocation3]  }
 0x200   :  { %408 = dma.done.wait [#allocation3], 16  }
 0x201   :  { %409 = vsyncadd [#allocation3], 4294967280 }
 0x202   :  { %338 = vsyncpa [#allocation3], 1 }

</bundles_post_ra>
